<compile_context>
chip_gen: v7x
topology: tpu7x:2x2x1
jax: 0.10.0
libtpu: 0.0.40
codegen_flags: <defaults>
</compile_context>

<pallas_src>
import functools

import jax
import jax.numpy as jnp
from jax.experimental import pallas as pl
from jax.experimental.pallas import tpu as pltpu


def _round_up(x, m):
    return (x + m - 1) // m * m


def dm_encoder_kernel(x_ref, w1_ref, b1_ref, w2_ref, b2_ref, w3_ref, b3_ref,
                      o_ref):
    # Layer 1: Linear (bf16 MXU, f32 accum) + bias + ReLU (f32 VPU)
    h = jnp.dot(x_ref[...], w1_ref[...],
                preferred_element_type=jnp.float32) + b1_ref[...]
    h = jnp.maximum(h, 0.0).astype(jnp.bfloat16)
    # Layer 2: Linear + bias + ReLU
    h = jnp.dot(h, w2_ref[...],
                preferred_element_type=jnp.float32) + b2_ref[...]
    h = jnp.maximum(h, 0.0).astype(jnp.bfloat16)
    # Layer 3: Linear + bias (no activation); output block is lane-dense
    # (last dim padded to a multiple of 128 by the wrapper).
    o_ref[...] = (jnp.dot(h, w3_ref[...],
                          preferred_element_type=jnp.float32) +
                  b3_ref[...]).astype(o_ref.dtype)


def dm_encoder(x, params, *, batch_tile=512):
    """x: (B, num_encoder_obs) float32. params: dict of W1,b1,W2,b2,W3,b3.

    Returns (B, encoder_hidden_dims[-1]) float32.
    """
    B, n_in = x.shape
    w1, b1 = params["W1"], params["b1"]
    w2, b2 = params["W2"], params["b2"]
    w3, b3 = params["W3"], params["b3"]
    h0, h1, h2 = w1.shape[1], w2.shape[1], w3.shape[1]

    # ---- layout plumbing (padding / bf16 casts), fused into HLO by XLA ----
    n_in_p = _round_up(n_in, 256)   # align K of the first (largest) matmul
    h2_p = _round_up(h2, 128)       # lane-dense output stores

    # Batch tile: big enough to amortize MXU fill/drain and reach HBM
    # roofline, small enough to stay well inside scoped VMEM on v7x.
    if B <= batch_tile:
        bt = max(16, _round_up(B, 16))     # bf16 sublane packing
    else:
        bt = batch_tile                    # default 512 (multiple of 256)
    B_p = _round_up(B, bt)
    grid = (B_p // bt,)
    # TODO(synk): for tiny production batches (B~8) this is pure launch/DMA
    # latency; batch multiple encoder calls into one invocation to see wins.

    x_p = (jnp.zeros((B_p, n_in_p), jnp.bfloat16)
           .at[:B, :n_in].set(x.astype(jnp.bfloat16)))
    w1_p = (jnp.zeros((n_in_p, h0), jnp.bfloat16)
            .at[:n_in, :].set(w1.astype(jnp.bfloat16)))
    w2_c = w2.astype(jnp.bfloat16)
    w3_p = (jnp.zeros((h1, h2_p), jnp.bfloat16)
            .at[:, :h2].set(w3.astype(jnp.bfloat16)))
    b1_c = b1.reshape(1, h0).astype(jnp.float32)
    b2_c = b2.reshape(1, h1).astype(jnp.float32)
    b3_p = (jnp.zeros((1, h2_p), jnp.float32)
            .at[:, :h2].set(b3.reshape(1, h2).astype(jnp.float32)))

    full = lambda i: (0, 0)
    out_p = pl.pallas_call(
        dm_encoder_kernel,
        out_shape=jax.ShapeDtypeStruct((B_p, h2_p), jnp.float32),
        grid_spec=pltpu.PrefetchScalarGridSpec(
            num_scalar_prefetch=0,
            grid=grid,
            in_specs=[
                pl.BlockSpec((bt, n_in_p), lambda i: (i, 0)),   # x tile
                pl.BlockSpec((n_in_p, h0), full),               # W1 (resident)
                pl.BlockSpec((1, h0), full),                    # b1
                pl.BlockSpec((h0, h1), full),                   # W2
                pl.BlockSpec((1, h1), full),                    # b2
                pl.BlockSpec((h1, h2_p), full),                 # W3
                pl.BlockSpec((1, h2_p), full),                  # b3
            ],
            out_specs=pl.BlockSpec((bt, h2_p), lambda i: (i, 0)),
        ),
        compiler_params=pltpu.CompilerParams(
            dimension_semantics=("parallel",)),
    )(x_p, w1_p, b1_c, w2_c, b2_c, w3_p, b3_p)

    return out_p[:B, :h2]


def init_params(key, num_encoder_obs, encoder_hidden_dims):
    """Deterministic init mimicking PyTorch's default Linear init (uniform in
    +-1/sqrt(fan_in)). Weights stored as (in, out), f32 master copies."""
    dims = [num_encoder_obs] + list(encoder_hidden_dims)
    params = {}
    for li in range(3):
        fan_in, fan_out = dims[li], dims[li + 1]
        key, kw, kb = jax.random.split(key, 3)
        bound = 1.0 / jnp.sqrt(float(fan_in))
        params[f"W{li+1}"] = jax.random.uniform(
            kw, (fan_in, fan_out), jnp.float32, -bound, bound)
        params[f"b{li+1}"] = jax.random.uniform(
            kb, (1, fan_out), jnp.float32, -bound, bound)
    return params


def dm_encoder_ref_f32(x, params):
    h = jnp.maximum(x @ params["W1"] + params["b1"], 0.0)
    h = jnp.maximum(h @ params["W2"] + params["b2"], 0.0)
    return h @ params["W3"] + params["b3"]


def dm_encoder_ref_bf16(x, params):
    """Reference that mirrors the kernel's bf16-operand / f32-accum math."""
    bf = jnp.bfloat16
    h = jnp.dot(x.astype(bf), params["W1"].astype(bf),
                preferred_element_type=jnp.float32) + params["b1"]
    h = jnp.maximum(h, 0.0).astype(bf)
    h = jnp.dot(h, params["W2"].astype(bf),
                preferred_element_type=jnp.float32) + params["b2"]
    h = jnp.maximum(h, 0.0).astype(bf)
    return jnp.dot(h, params["W3"].astype(bf),
                   preferred_element_type=jnp.float32) + params["b3"]


if __name__ == "__main__":
    # Small, forward-consistent shapes: depth map of 187 obs, hidden dims
    # [128, 64, 32], batch of 8.
    num_encoder_obs = 187
    encoder_hidden_dims = (128, 64, 32)
    B = 8

    key = jax.random.PRNGKey(0)
    key, kx = jax.random.split(key)
    x = jax.random.normal(kx, (B, num_encoder_obs), jnp.float32)
    params = init_params(key, num_encoder_obs, encoder_hidden_dims)

    run = jax.jit(functools.partial(dm_encoder, batch_tile=512))
    out = jax.block_until_ready(run(x, params))

    assert out.shape == (B, encoder_hidden_dims[-1])
    # Tight check against a bf16-emulated reference (same math as the kernel).
    ref_bf16 = dm_encoder_ref_bf16(x, params)
    assert jnp.allclose(out, ref_bf16, atol=5e-3, rtol=5e-3)
    # Loose check against the full-f32 PyTorch-equivalent forward.
    ref_f32 = dm_encoder_ref_f32(x, params)
    assert jnp.allclose(out, ref_f32, atol=5e-2, rtol=5e-2)

    print("KERNEL_OK")
</pallas_src>

<mosaic_0001>
module attributes {stable_mosaic.version = 11 : i64} {
  func.func @dm_encoder_kernel(%arg0: i32, %arg1: memref<16x256xbf16, #tpu.memory_space<vmem>>, %arg2: memref<256x128xbf16, #tpu.memory_space<vmem>>, %arg3: memref<1x128xf32, #tpu.memory_space<vmem>>, %arg4: memref<128x64xbf16, #tpu.memory_space<vmem>>, %arg5: memref<1x64xf32, #tpu.memory_space<vmem>>, %arg6: memref<64x128xbf16, #tpu.memory_space<vmem>>, %arg7: memref<1x128xf32, #tpu.memory_space<vmem>>, %arg8: memref<16x128xf32, #tpu.memory_space<vmem>>) attributes {dimension_semantics = [#tpu.dimension_semantics<parallel>], iteration_bounds = array<i64: 1>, scalar_prefetch = 0 : i64, scratch_operands = 0 : i64, tpu.core_type = #tpu.core_type<tc>, window_params = [{transform_indices = @transform_0, window_bounds = array<i64: 16, 256>}, {pipeline_mode = #tpu.pipeline_mode<synchronous>, transform_indices = @transform_1, window_bounds = array<i64: 256, 128>}, {pipeline_mode = #tpu.pipeline_mode<synchronous>, transform_indices = @transform_2, window_bounds = array<i64: 1, 128>}, {pipeline_mode = #tpu.pipeline_mode<synchronous>, transform_indices = @transform_3, window_bounds = array<i64: 128, 64>}, {pipeline_mode = #tpu.pipeline_mode<synchronous>, transform_indices = @transform_4, window_bounds = array<i64: 1, 64>}, {pipeline_mode = #tpu.pipeline_mode<synchronous>, transform_indices = @transform_5, window_bounds = array<i64: 64, 128>}, {pipeline_mode = #tpu.pipeline_mode<synchronous>, transform_indices = @transform_6, window_bounds = array<i64: 1, 128>}, {transform_indices = @transform_7, window_bounds = array<i64: 16, 128>}]} {
    %c0 = arith.constant 0 : index
    %c0_0 = arith.constant 0 : index
    %0 = vector.load %arg1[%c0, %c0_0] : memref<16x256xbf16, #tpu.memory_space<vmem>>, vector<16x256xbf16>
    %c0_1 = arith.constant 0 : index
    %c0_2 = arith.constant 0 : index
    %1 = vector.load %arg2[%c0_1, %c0_2] : memref<256x128xbf16, #tpu.memory_space<vmem>>, vector<256x128xbf16>
    %cst = arith.constant dense<0.000000e+00> : vector<16x128xf32>
    %2 = tpu.matmul %0, %1, %cst {dimension_numbers = #tpu.dot_dimension_numbers<[1], [0], [0], [1], [0, 0, 1, 1], [], []>} : vector<16x256xbf16>, vector<256x128xbf16>, vector<16x128xf32> -> vector<16x128xf32>
    %c0_3 = arith.constant 0 : index
    %c0_4 = arith.constant 0 : index
    %3 = vector.load %arg3[%c0_3, %c0_4] : memref<1x128xf32, #tpu.memory_space<vmem>>, vector<1x128xf32>
    %4 = vector.broadcast %3 : vector<1x128xf32> to vector<16x128xf32>
    %5 = arith.addf %2, %4 : vector<16x128xf32>
    %cst_5 = arith.constant 0.000000e+00 : f32
    %6 = vector.broadcast %cst_5 : f32 to vector<16x128xf32>
    %7 = arith.maximumf %5, %6 : vector<16x128xf32>
    %8 = arith.truncf %7 : vector<16x128xf32> to vector<16x128xbf16>
    %c0_6 = arith.constant 0 : index
    %c0_7 = arith.constant 0 : index
    %9 = vector.load %arg4[%c0_6, %c0_7] : memref<128x64xbf16, #tpu.memory_space<vmem>>, vector<128x64xbf16>
    %cst_8 = arith.constant dense<0.000000e+00> : vector<16x64xf32>
    %10 = tpu.matmul %8, %9, %cst_8 {dimension_numbers = #tpu.dot_dimension_numbers<[1], [0], [0], [1], [0, 0, 1, 1], [], []>} : vector<16x128xbf16>, vector<128x64xbf16>, vector<16x64xf32> -> vector<16x64xf32>
    %c0_9 = arith.constant 0 : index
    %c0_10 = arith.constant 0 : index
    %11 = vector.load %arg5[%c0_9, %c0_10] : memref<1x64xf32, #tpu.memory_space<vmem>>, vector<1x64xf32>
    %12 = vector.broadcast %11 : vector<1x64xf32> to vector<16x64xf32>
    %13 = arith.addf %10, %12 : vector<16x64xf32>
    %cst_11 = arith.constant 0.000000e+00 : f32
    %14 = vector.broadcast %cst_11 : f32 to vector<16x64xf32>
    %15 = arith.maximumf %13, %14 : vector<16x64xf32>
    %16 = arith.truncf %15 : vector<16x64xf32> to vector<16x64xbf16>
    %c0_12 = arith.constant 0 : index
    %c0_13 = arith.constant 0 : index
    %17 = vector.load %arg6[%c0_12, %c0_13] : memref<64x128xbf16, #tpu.memory_space<vmem>>, vector<64x128xbf16>
    %cst_14 = arith.constant dense<0.000000e+00> : vector<16x128xf32>
    %18 = tpu.matmul %16, %17, %cst_14 {dimension_numbers = #tpu.dot_dimension_numbers<[1], [0], [0], [1], [0, 0, 1, 1], [], []>} : vector<16x64xbf16>, vector<64x128xbf16>, vector<16x128xf32> -> vector<16x128xf32>
    %c0_15 = arith.constant 0 : index
    %c0_16 = arith.constant 0 : index
    %19 = vector.load %arg7[%c0_15, %c0_16] : memref<1x128xf32, #tpu.memory_space<vmem>>, vector<1x128xf32>
    %20 = vector.broadcast %19 : vector<1x128xf32> to vector<16x128xf32>
    %21 = arith.addf %18, %20 : vector<16x128xf32>
    %c0_17 = arith.constant 0 : index
    %c0_18 = arith.constant 0 : index
    %22 = vector.load %arg8[%c0_17, %c0_18] : memref<16x128xf32, #tpu.memory_space<vmem>>, vector<16x128xf32>
    tpu.vector_store %arg8[%c0_17, %c0_18], %21 {strides = array<i32>} : memref<16x128xf32, #tpu.memory_space<vmem>>, vector<16x128xf32>,
    return
  }
  func.func @transform_0(%arg0: i32) -> (i32, i32) {
    %c0_i32 = arith.constant 0 : i32
    %c0_i32_0 = arith.constant 0 : i32
    return %arg0, %c0_i32 : i32, i32
  }
  func.func @transform_1(%arg0: i32) -> (i32, i32) {
    %c0_i32 = arith.constant 0 : i32
    %c0_i32_0 = arith.constant 0 : i32
    %c0_i32_1 = arith.constant 0 : i32
    return %c0_i32, %c0_i32_0 : i32, i32
  }
  func.func @transform_2(%arg0: i32) -> (i32, i32) {
    %c0_i32 = arith.constant 0 : i32
    %c0_i32_0 = arith.constant 0 : i32
    %c0_i32_1 = arith.constant 0 : i32
    return %c0_i32, %c0_i32_0 : i32, i32
  }
  func.func @transform_3(%arg0: i32) -> (i32, i32) {
    %c0_i32 = arith.constant 0 : i32
    %c0_i32_0 = arith.constant 0 : i32
    %c0_i32_1 = arith.constant 0 : i32
    return %c0_i32, %c0_i32_0 : i32, i32
  }
  func.func @transform_4(%arg0: i32) -> (i32, i32) {
    %c0_i32 = arith.constant 0 : i32
    %c0_i32_0 = arith.constant 0 : i32
    %c0_i32_1 = arith.constant 0 : i32
    return %c0_i32, %c0_i32_0 : i32, i32
  }
  func.func @transform_5(%arg0: i32) -> (i32, i32) {
    %c0_i32 = arith.constant 0 : i32
    %c0_i32_0 = arith.constant 0 : i32
    %c0_i32_1 = arith.constant 0 : i32
    return %c0_i32, %c0_i32_0 : i32, i32
  }
  func.func @transform_6(%arg0: i32) -> (i32, i32) {
    %c0_i32 = arith.constant 0 : i32
    %c0_i32_0 = arith.constant 0 : i32
    %c0_i32_1 = arith.constant 0 : i32
    return %c0_i32, %c0_i32_0 : i32, i32
  }
  func.func @transform_7(%arg0: i32) -> (i32, i32) {
    %c0_i32 = arith.constant 0 : i32
    %c0_i32_0 = arith.constant 0 : i32
    return %arg0, %c0_i32 : i32, i32
  }
}

</mosaic_0001>

<bundles_post_ra>
// kernel: dm_encoder.1
= control target key start
LH: loop header
LB: loop body
LE: loop exit
PB: predicated region body
PF: predicated region fallthrough
CT: control target
= control target key end

     0   :  { %v558_v1 = vmov 0.0   ;;  %vm559_vm0 = vmmov 0   ;;  %vm372_vm1 = vcmask 523264   ;;  %s719_s1 = inlined_call_operand.vmem [shape: bf16[256,128], index: 1, kind: input, shape index: {}]   ;;  %s720_s0 = inlined_call_operand.vmem [shape: bf16[16,256], index: 0, kind: input, shape index: {}]   ;;  %s721_s3 = inlined_call_operand.vmem [shape: bf16[128,64], index: 3, kind: input, shape index: {}]   ;;  %s722_s5 = inlined_call_operand.vmem [shape: bf16[64,128], index: 5, kind: input, shape index: {}]   ;;  %s723_s2 = inlined_call_operand.vmem [shape: f32[1,128], index: 2, kind: input, shape index: {}]   ;;  %s724_s4 = inlined_call_operand.vmem [shape: f32[1,64], index: 4, kind: input, shape index: {}]   ;;  %s725_s6 = inlined_call_operand.vmem [shape: f32[1,128], index: 6, kind: input, shape index: {}]   ;;  %s726_s7 = inlined_call_operand.vmem [shape: f32[16,128], index: 7, kind: output, shape index: {}]  }
   0x1   :  { %v527_v0 = vld [vmem:[%s719_s1 + $0x40] sm:$0xff]   ;;  %493 = vmatprep.subr.bf16.mxu1 %v558_v1  ;;  %v529_v3 = vld [vmem:[%s719_s1 + $0x48] sm:$0xff]   ;;  %v531_v5 = vld [vmem:[%s719_s1 + $0x50] sm:$0xff]   ;;  %509 = vmatprep.mubr.msk.bf16.mxu1 %vm559_vm0, %v558_v1 }
   0x2   :  { %v528_v2 = vld [vmem:[%s719_s1] sm:$0xff]   ;;  %457 = vmatprep.subr.bf16.mxu0 %v527_v0  ;;  %v530_v4 = vld [vmem:[%s719_s1 + $0x8] sm:$0xff]   ;;  %v532_v6 = vld [vmem:[%s719_s1 + $0x10] sm:$0xff]  }
   0x3   :  { %458 = vmatpush3.bf16.msra.mxu0 %v528_v2  ;;  %v533_v7 = vld [vmem:[%s719_s1 + $0x58] sm:$0xff]   ;;  %v535_v9 = vld [vmem:[%s719_s1 + $0x60] sm:$0xff]   ;;  %v537_v11 = vld [vmem:[%s719_s1 + $0x68] sm:$0xff]  }
   0x4   :  { %459 = vmatprep.subr.bf16.mxu0 %v529_v3  ;;  %v534_v8 = vld [vmem:[%s719_s1 + $0x18] sm:$0xff]   ;;  %v536_v10 = vld [vmem:[%s719_s1 + $0x20] sm:$0xff]   ;;  %v538_v12 = vld [vmem:[%s719_s1 + $0x28] sm:$0xff]  }
   0x5   :  { %v545_v13 = vld [vmem:[%s720_s0 + $0x4] ss:$8 sps:$4 sm:$0xff]   ;;  %v539_v15 = vld [vmem:[%s719_s1 + $0x70] sm:$0xff]   ;;  %v541_v18 = vld [vmem:[%s719_s1 + $0x78] sm:$0xff]  }
   0x6   :  { %v546_v14 = vld [vmem:[%s721_s3] sm:$0xff]   ;;  %206 = vmatprep.mubr.bf16.mxu0 %v545_v13  ;;  %v547_v16 = vld [vmem:[%s721_s3 + $0x8] sm:$0xff]   ;;  %v540_v17 = vld [vmem:[%s719_s1 + $0x30] sm:$0xff]  }
   0x7   :  { %460 = vmatpush3.bf16.msra.mxu0 %v530_v4  ;;  %494 = vmatpush3.bf16.msra.mxu1 %v546_v14  ;;  %v548_v19 = vld [vmem:[%s721_s3 + $0x10] sm:$0xff]   ;;  %v542_v20 = vld [vmem:[%s719_s1 + $0x38] sm:$0xff]   ;;  %v543_v22 = vld [vmem:[%s720_s0] ss:$8 sps:$4 sm:$0xff]  }
   0x8   :  { %461 = vmatprep.subr.bf16.mxu0 %v531_v5  ;;  %495 = vmatprep.subr.bf16.mxu1 %v558_v1  ;;  %v549_v21 = vld [vmem:[%s721_s3 + $0x18] sm:$0xff]   ;;  %v550_v23 = vld [vmem:[%s721_s3 + $0x20] sm:$0xff]   ;;  %v551_v24 = vld [vmem:[%s721_s3 + $0x28] sm:$0xff]  }
   0x9   :  { %v552_v25 = vld [vmem:[%s721_s3 + $0x30] sm:$0xff]   ;;  %v553_v26 = vld [vmem:[%s721_s3 + $0x38] sm:$0xff]   ;;  %v554_v27 = vld [vmem:[%s722_s5] sm:$0xff]  }
   0xa   :  { %v555_v28 = vld [vmem:[%s722_s5 + $0x8] sm:$0xff]   ;;  %v423_v30 = vld [vmem:[%s723_s2] ss:$0 sm:$0xff]  ;;  %v556_v41 = vld [vmem:[%s722_s5 + $0x10] sm:$0xff]  }
   0xb   :  { %462 = vmatpush3.bf16.msra.mxu0 %v532_v6  ;;  %496 = vmatpush3.bf16.msra.mxu1 %v547_v16  ;;  %v557_v42 = vld [vmem:[%s722_s5 + $0x18] sm:$0xff]   ;;  %v442_v43 = vld [vmem:[%s724_s4] ss:$0 sm:$0xff] }
   0xc   :  { %463 = vmatprep.subr.bf16.mxu0 %v533_v7  ;;  %497 = vmatprep.subr.bf16.mxu1 %v558_v1  ;;  %v451_v53 = vld [vmem:[%s725_s6] ss:$0 sm:$0xff] }
   0xf   :  { %464 = vmatpush3.bf16.msra.mxu0 %v534_v8  ;;  %498 = vmatpush3.bf16.msra.mxu1 %v548_v19 }
  0x10   :  { %465 = vmatprep.subr.bf16.mxu0 %v535_v9  ;;  %499 = vmatprep.subr.bf16.mxu1 %v558_v1 }
  0x13   :  { %466 = vmatpush3.bf16.msra.mxu0 %v536_v10  ;;  %500 = vmatpush3.bf16.msra.mxu1 %v549_v21 }
  0x14   :  { %467 = vmatprep.subr.bf16.mxu0 %v537_v11  ;;  %501 = vmatprep.subr.bf16.mxu1 %v558_v1 }
  0x17   :  { %468 = vmatpush3.bf16.msra.mxu0 %v538_v12  ;;  %502 = vmatpush3.bf16.msra.mxu1 %v550_v23 }
  0x18   :  { %469 = vmatprep.subr.bf16.mxu0 %v539_v15  ;;  %503 = vmatprep.subr.bf16.mxu1 %v558_v1 }
  0x1b   :  { %470 = vmatpush3.bf16.msra.mxu0 %v540_v17  ;;  %504 = vmatpush3.bf16.msra.mxu1 %v551_v24 }
  0x1c   :  { %471 = vmatprep.subr.bf16.mxu0 %v541_v18  ;;  %505 = vmatprep.subr.bf16.mxu1 %v558_v1 }
  0x1f   :  { %472 = vmatpush3.bf16.msra.mxu0 %v542_v20  ;;  %506 = vmatpush3.bf16.msra.mxu1 %v552_v25 }
  0x20   :  { %513 = vmatprep.subr.bf16.mxu0 %v558_v1  ;;  %507 = vmatprep.subr.bf16.mxu1 %v558_v1 }
  0x22   :  { %207 = vmatmul.mubr.bf16.vlgmr.msra.gmra.mrb[0].mxu0 %v543_v22 }
  0x23   :  { %508 = vmatpush3.bf16.msra.mxu1 %v553_v26  ;;  %521 = vmatprep.mubr.msk.bf16.mxu0 %vm559_vm0, %v558_v1 }
  0x24   :  { %514 = vmatpush3.bf16.msra.mxu0 %v554_v27 }
  0x25   :  { %515 = vmatprep.subr.bf16.mxu0 %v558_v1 }
  0x28   :  { %516 = vmatpush3.bf16.msra.mxu0 %v555_v28 }
  0x29   :  { %517 = vmatprep.subr.bf16.mxu0 %v558_v1 }
  0x2c   :  { %518 = vmatpush3.bf16.msra.mxu0 %v556_v41 }
  0x2d   :  { %519 = vmatprep.subr.bf16.mxu0 %v558_v1 }
  0x30   :  { %520 = vmatpush3.bf16.msra.mxu0 %v557_v42 }
  0xf5   :  { %v473_v29 = vpop.f32.mrb[0].mxu0 }
  0xf6   :  { %v474_v31 = vpop.f32.mrb[1].mxu0 }
  0xf7   :  { %v475_v32 = vadd.f32 %v474_v31, %v473_v29  ;;  %v476_v33 = vpop.f32.mrb[2].mxu0 }
  0xf8   :  { %v477_v34 = vpop.f32.mrb[3].mxu0 }
  0xf9   :  { %v209_v35 = vadd.f32 %v475_v32, %v423_v30  ;;  %v478_v36 = vadd.f32 %v477_v34, %v476_v33 }
  0xfb   :  { %v212_v37 = vadd.f32 %v478_v36, %v423_v30  ;;  %v215_v38 = vmax.f32 %v209_v35, 0.0 }
  0xfd   :  { %v216_v39 = vmax.f32 %v212_v37, 0.0 }
  0xff   :  { %v217_v40 = vpack.c.bf16 %v216_v39, %v215_v38 }
 0x101   :  { %510 = vmatmul.mubr.bf16.vlgmr.msra.gmra.mrb[0].mxu1 %v217_v40 }
 0x1d4   :  { %v323_v44 = vpop.f32.mrb[0].mxu1 }
 0x1d5   :  { %v324_v45 = vadd.f32 %v442_v43, %v323_v44  ;;  %v511_v46 = vpop.f32.mrb[1].mxu1 }
 0x1d6   :  { %v326_v47 = vpop.f32.mrb[2].mxu1 }
 0x1d7   :  { %v327_v48 = vadd.f32 %v442_v43, %v326_v47  ;;  %v512_v49 = vpop.f32.mrb[3].mxu1  ;;  %v330_v50 = vmax.f32 %v324_v45, 0.0 }
 0x1d9   :  { %v331_v51 = vmax.f32 %v327_v48, 0.0 }
 0x1db   :  { %v332_v52 = vpack.c.bf16 %v331_v51, %v330_v50 }
 0x1dd   :  { %522 = vmatmul.mubr.msk.bf16.vlgmr.msra.gmra.mrb[4].mxu0 %vm372_vm1, %v332_v52 }
 0x2b0   :  { %v410_v54 = vpop.f32.mrb[4].mxu0 }
 0x2b1   :  { %v411_v55 = vadd.f32 %v451_v53, %v410_v54  ;;  %v523_v56 = vpop.f32.mrb[5].mxu0 }
 0x2b2   :  { %v413_v57 = vpop.f32.mrb[6].mxu0 }
 0x2b3   :  { %417 = vst [vmem:[%s726_s7] sm:$0xff] %v411_v55  ;;  %v414_v58 = vadd.f32 %v451_v53, %v413_v57  ;;  %v524_v59 = vpop.f32.mrb[7].mxu0 }
 0x2b5   :  { %418 = vst [vmem:[%s726_s7 + $0x8] sm:$0xff] %v414_v58 }

</bundles_post_ra>
